<compile_context>
chip_gen: v7x
topology: tpu7x:2x2x1
jax: 0.10.0
libtpu: 0.0.40
codegen_flags: <defaults>
</compile_context>

<pallas_src>
import functools

import jax
import jax.numpy as jnp
from jax import lax
from jax.experimental import pallas as pl
from jax.experimental.pallas import tpu as pltpu


# 3x3 taps in (kh, kw) order, expressed as (dh, dw) offsets from the centre.
_TAPS = tuple((dh, dw) for dh in (-1, 0, 1) for dw in (-1, 0, 1))


def _row_col(lane, H, W):
    """Per-lane (row, col) within the image for flat index lane = n*H*W + i*W + j."""
    if W > 0 and (W & (W - 1)) == 0 and H > 0 and (H & (H - 1)) == 0:
        # Powers of two: pure VPU bit ops (guaranteed to lower).
        col = lane & (W - 1)
        row = (lane >> (W.bit_length() - 1)) & (H - 1)
    else:
        # TODO(synk): relies on vector i32 div/rem lowering for non-power-of-2
        # H/W; if Mosaic rejects it, pass 4 wrapper-computed edge masks as a
        # small (4, L) f32 input instead.
        col = lane % W
        row = (lane // W) % H
    return row, col


def _resblock_kernel(res_scale, H, W, C, Cmid, L, mm_dtype,
                     x_ref, w1_ref, w2_ref, o_ref, p1_ref, p2_ref):
    """Fused ResBlock_A for one chunk of images (channels on sublanes,
    flattened (image, row, col) on lanes).

    x_ref  : (C, L)            input, L = images_per_chunk * H * W
    w1_ref : (Cmid, 9*C + 1)   im2col conv1 weights, bias as last column
    w2_ref : (C, 9*Cmid + 1)   im2col conv2 weights, bias as last column
    o_ref  : (C, L)            output (lane-dense, unmasked stores)
    p1_ref : (9*C + 1, L)      VMEM scratch: conv1 patch matrix (+ ones row)
    p2_ref : (9*Cmid + 1, L)   VMEM scratch: conv2 patch matrix (+ ones row)
    """
    x = x_ref[...]                                  # (C, L) f32

    # ---- zero-padding edge masks, generated in-kernel (iota + compares) ---
    lane = lax.broadcasted_iota(jnp.int32, (1, L), 1)
    row, col = _row_col(lane, H, W)
    f32 = jnp.float32
    m_top = (row >= 1).astype(f32)                  # needed when dh == -1
    m_bot = (row <= H - 2).astype(f32)              # needed when dh == +1
    m_lft = (col >= 1).astype(f32)                  # needed when dw == -1
    m_rgt = (col <= W - 2).astype(f32)              # needed when dw == +1

    tap_masks = []
    for dh, dw in _TAPS:
        m = None
        for use, mm in ((dh == -1, m_top), (dh == 1, m_bot),
                        (dw == -1, m_lft), (dw == 1, m_rgt)):
            if use:
                m = mm if m is None else m * mm
        tap_masks.append(m)                         # None for the centre tap

    ones_row = jnp.ones((1, L), mm_dtype)

    def build_patches(a, cin, p_ref):
        # Assemble the (9*cin + 1, L) im2col patch matrix.  Each tap shift is
        # a static lane roll (XLU, free slot); out-of-bounds pixels (the
        # conv's zero padding) are killed with the per-tap edge mask.  Rolls
        # wrap across image boundaries only at positions where the mask is 0,
        # so images stacked on lanes never contaminate each other.
        # TODO(synk): feeding the matmul from a vreg-resident concatenate of
        # the 9 pieces (skipping this VMEM round-trip) may help further --
        # verify with a bundle dump that Mosaic does not spill it back.
        for t, (dh, dw) in enumerate(_TAPS):
            if dh == 0 and dw == 0:
                piece = a                            # centre tap, no mask
            else:
                shift = (-(dh * W + dw)) % L         # static python int
                piece = pltpu.roll(a, shift, 1) * tap_masks[t]
            p_ref[t * cin:(t + 1) * cin, :] = piece.astype(mm_dtype)
        # Constant-1 row folds the bias into the matmul K (NOT masked).
        p_ref[9 * cin:9 * cin + 1, :] = ones_row

    # ---- conv1 (3x3, pad=1) + bias + ReLU: one MXU matmul, K = 9*C + 1 ----
    # NOTE: MXU is <5% utilized at M=Cmid=8, K=37 -- latency, not throughput.
    build_patches(x, C, p1_ref)
    h = jnp.dot(w1_ref[...], p1_ref[...], preferred_element_type=jnp.float32)
    h = jnp.maximum(h, 0.0)                          # (Cmid, L) f32

    # ---- conv2 (3x3, pad=1) + bias: one MXU matmul, K = 9*Cmid + 1 --------
    build_patches(h, Cmid, p2_ref)
    y = jnp.dot(w2_ref[...], p2_ref[...], preferred_element_type=jnp.float32)

    # ---- scaled residual add, lane-dense store -----------------------------
    o_ref[...] = (x * res_scale + y).astype(o_ref.dtype)


def resblock_a_pallas(x_nchw, w1_oihw, b1, w2_oihw, b2, res_scale=1.0,
                      num_chunks=1, matmul_dtype=jnp.float32):
    """ResBlock_A forward.

    x_nchw:  (N, C, H, W) f32.  Returns (N, C, H, W).
    num_chunks: grid size; 1 = whole batch in one step (best on single-TC
        v5e/v6e), 2 = one chunk per TensorCore on v7x megacore.
    matmul_dtype: dtype of the MXU operands (weights + patch matrices).
        jnp.bfloat16 on v6e/v7x halves HBM/VMEM/vreg bytes and gets the
        native single-pass MXU rate (f32 accumulation kept); expect ~1e-2
        agreement with the f32 reference instead of 1e-4.  Masks, ReLU and
        the residual add stay in f32 (v5e VPU has no bf16).
    """
    N, C, H, W = x_nchw.shape
    Cmid = w1_oihw.shape[0]
    HW = H * W
    assert w1_oihw.shape == (Cmid, C, 3, 3)
    assert w2_oihw.shape == (C, Cmid, 3, 3)
    assert N % num_chunks == 0
    L = (N // num_chunks) * HW                      # lanes per grid step
    if num_chunks > 1:
        assert L % 128 == 0, "per-chunk lane extent must be a multiple of 128"

    # One relayout: channels on sublanes, all images side-by-side on lanes.
    x_cl = jnp.transpose(x_nchw, (1, 0, 2, 3)).reshape(C, N * HW)

    # Fold the 3x3 taps into the contraction dim (im2col weights) and append
    # the bias as an extra K column (pairs with the kernel's ones row):
    #   w_aug[o, t*Cin + c] = w[o, c, kh, kw] with t = kh*3 + kw
    #   w_aug[o, 9*Cin]     = b[o]
    w1_mat = jnp.transpose(w1_oihw, (0, 2, 3, 1)).reshape(Cmid, 9 * C)
    w2_mat = jnp.transpose(w2_oihw, (0, 2, 3, 1)).reshape(C, 9 * Cmid)
    w1_aug = jnp.concatenate([w1_mat, b1.reshape(Cmid, 1)], axis=1)
    w2_aug = jnp.concatenate([w2_mat, b2.reshape(C, 1)], axis=1)
    w1_aug = w1_aug.astype(matmul_dtype)
    w2_aug = w2_aug.astype(matmul_dtype)

    kernel = functools.partial(_resblock_kernel, float(res_scale),
                               H, W, C, Cmid, L, matmul_dtype)

    out_cl = pl.pallas_call(
        kernel,
        out_shape=jax.ShapeDtypeStruct((C, N * HW), x_nchw.dtype),
        grid_spec=pltpu.PrefetchScalarGridSpec(
            num_scalar_prefetch=0,
            grid=(num_chunks,),
            in_specs=[
                pl.BlockSpec((C, L), lambda g: (0, g)),              # x chunk
                pl.BlockSpec((Cmid, 9 * C + 1), lambda g: (0, 0)),   # w1+b1
                pl.BlockSpec((C, 9 * Cmid + 1), lambda g: (0, 0)),   # w2+b2
            ],
            out_specs=pl.BlockSpec((C, L), lambda g: (0, g)),
            scratch_shapes=[
                pltpu.VMEM((9 * C + 1, L), matmul_dtype),     # conv1 patches
                pltpu.VMEM((9 * Cmid + 1, L), matmul_dtype),  # conv2 patches
            ],
        ),
        compiler_params=pltpu.CompilerParams(
            dimension_semantics=("parallel",)),
    )(x_cl, w1_aug, w2_aug)

    # Free-ish relayout back to NCHW.
    return jnp.transpose(out_cl.reshape(C, N, H, W), (1, 0, 2, 3))


def weight_norm(v_oihw, g):
    """PyTorch weight_norm (dim=0): w[o] = g[o] * v[o] / ||v[o]||_2."""
    norm = jnp.sqrt(jnp.sum(v_oihw ** 2, axis=(1, 2, 3), keepdims=True))
    return g.reshape(-1, 1, 1, 1) * v_oihw / norm


def ref_forward(x_nchw, w1_oihw, b1, w2_oihw, b2, res_scale):
    """Plain-JAX reference of ResBlock_A.forward (verification only)."""
    dn = ("NCHW", "OIHW", "NCHW")
    y = lax.conv_general_dilated(x_nchw, w1_oihw, (1, 1),
                                 padding=((1, 1), (1, 1)),
                                 dimension_numbers=dn)
    y = y + b1[None, :, None, None]
    y = jnp.maximum(y, 0.0)
    y = lax.conv_general_dilated(y, w2_oihw, (1, 1),
                                 padding=((1, 1), (1, 1)),
                                 dimension_numbers=dn)
    y = y + b2[None, :, None, None]
    return x_nchw * res_scale + y


if __name__ == "__main__":
    # ResBlock_A(n_feats=4, expansion_ratio=2, res_scale=1.0)
    n_feats, expansion_ratio, res_scale = 4, 2, 1.0
    N, C, H, W = 2, n_feats, 16, 16
    Cmid = n_feats * expansion_ratio

    key = jax.random.PRNGKey(0)
    kx, kv1, kg1, kb1, kv2, kg2, kb2 = jax.random.split(key, 7)

    x = jax.random.normal(kx, (N, C, H, W), jnp.float32)

    # weight_norm parameters: v (direction), g (magnitude), plus biases.
    v1 = jax.random.normal(kv1, (Cmid, C, 3, 3), jnp.float32) * 0.2
    g1 = jax.random.uniform(kg1, (Cmid,), jnp.float32, 0.5, 1.5)
    b1 = jax.random.normal(kb1, (Cmid,), jnp.float32) * 0.1
    v2 = jax.random.normal(kv2, (C, Cmid, 3, 3), jnp.float32) * 0.2
    g2 = jax.random.uniform(kg2, (C,), jnp.float32, 0.5, 1.5)
    b2 = jax.random.normal(kb2, (C,), jnp.float32) * 0.1

    # Effective (weight-normed) conv weights, OIHW like PyTorch.
    w1_oihw = weight_norm(v1, g1)        # (Cmid, C, 3, 3)
    w2_oihw = weight_norm(v2, g2)        # (C, Cmid, 3, 3)

    ref = ref_forward(x, w1_oihw, b1, w2_oihw, b2, res_scale)

    # Single grid step, whole batch on lanes (best on single-TC v5e/v6e).
    out = resblock_a_pallas(x, w1_oihw, b1, w2_oihw, b2, res_scale,
                            num_chunks=1)
    out = jax.block_until_ready(out)
    assert out.shape == (N, C, H, W)
    assert jnp.allclose(out, ref, rtol=1e-4, atol=1e-4), (
        f"num_chunks=1 max abs err = {jnp.max(jnp.abs(out - ref))}")

    # Two-way parallel grid (one chunk per TensorCore on v7x megacore).
    out2 = resblock_a_pallas(x, w1_oihw, b1, w2_oihw, b2, res_scale,
                             num_chunks=2)
    out2 = jax.block_until_ready(out2)
    assert jnp.allclose(out2, ref, rtol=1e-4, atol=1e-4), (
        f"num_chunks=2 max abs err = {jnp.max(jnp.abs(out2 - ref))}")

    print("KERNEL_OK")
</pallas_src>

<mosaic_0001>
module attributes {stable_mosaic.version = 11 : i64} {
  func.func @_resblock_kernel(%arg0: i32, %arg1: memref<4x512xf32, #tpu.memory_space<vmem>>, %arg2: memref<8x37xf32, #tpu.memory_space<vmem>>, %arg3: memref<4x73xf32, #tpu.memory_space<vmem>>, %arg4: memref<4x512xf32, #tpu.memory_space<vmem>>, %arg5: memref<37x512xf32, #tpu.memory_space<vmem>>, %arg6: memref<73x512xf32, #tpu.memory_space<vmem>>) attributes {dimension_semantics = [#tpu.dimension_semantics<parallel>], iteration_bounds = array<i64: 1>, scalar_prefetch = 0 : i64, scratch_operands = 2 : i64, tpu.core_type = #tpu.core_type<tc>, window_params = [{transform_indices = @transform_0, window_bounds = array<i64: 4, 512>}, {pipeline_mode = #tpu.pipeline_mode<synchronous>, transform_indices = @transform_1, window_bounds = array<i64: 8, 37>}, {pipeline_mode = #tpu.pipeline_mode<synchronous>, transform_indices = @transform_2, window_bounds = array<i64: 4, 73>}, {transform_indices = @transform_3, window_bounds = array<i64: 4, 512>}]} {
    %c0 = arith.constant 0 : index
    %c0_0 = arith.constant 0 : index
    %0 = vector.load %arg1[%c0, %c0_0] : memref<4x512xf32, #tpu.memory_space<vmem>>, vector<4x512xf32>
    %1 = tpu.iota {dimensions = array<i32: 1>} : vector<1x512xi32>
    %c15_i32 = arith.constant 15 : i32
    %2 = vector.broadcast %c15_i32 : i32 to vector<1x512xi32>
    %3 = arith.andi %1, %2 : vector<1x512xi32>
    %c4_i32 = arith.constant 4 : i32
    %4 = vector.broadcast %c4_i32 : i32 to vector<1x512xi32>
    %5 = arith.shrsi %1, %4 : vector<1x512xi32>
    %c15_i32_1 = arith.constant 15 : i32
    %6 = vector.broadcast %c15_i32_1 : i32 to vector<1x512xi32>
    %7 = arith.andi %5, %6 : vector<1x512xi32>
    %c1_i32 = arith.constant 1 : i32
    %8 = vector.broadcast %c1_i32 : i32 to vector<1x512xi32>
    %9 = arith.cmpi sge, %7, %8 : vector<1x512xi32>
    %10 = arith.extui %9 : vector<1x512xi1> to vector<1x512xi32>
    %11 = arith.sitofp %10 : vector<1x512xi32> to vector<1x512xf32>
    %c14_i32 = arith.constant 14 : i32
    %12 = vector.broadcast %c14_i32 : i32 to vector<1x512xi32>
    %13 = arith.cmpi sle, %7, %12 : vector<1x512xi32>
    %14 = arith.extui %13 : vector<1x512xi1> to vector<1x512xi32>
    %15 = arith.sitofp %14 : vector<1x512xi32> to vector<1x512xf32>
    %c1_i32_2 = arith.constant 1 : i32
    %16 = vector.broadcast %c1_i32_2 : i32 to vector<1x512xi32>
    %17 = arith.cmpi sge, %3, %16 : vector<1x512xi32>
    %18 = arith.extui %17 : vector<1x512xi1> to vector<1x512xi32>
    %19 = arith.sitofp %18 : vector<1x512xi32> to vector<1x512xf32>
    %c14_i32_3 = arith.constant 14 : i32
    %20 = vector.broadcast %c14_i32_3 : i32 to vector<1x512xi32>
    %21 = arith.cmpi sle, %3, %20 : vector<1x512xi32>
    %22 = arith.extui %21 : vector<1x512xi1> to vector<1x512xi32>
    %23 = arith.sitofp %22 : vector<1x512xi32> to vector<1x512xf32>
    %24 = arith.mulf %11, %19 : vector<1x512xf32>
    %25 = arith.mulf %11, %23 : vector<1x512xf32>
    %26 = arith.mulf %15, %19 : vector<1x512xf32>
    %27 = arith.mulf %15, %23 : vector<1x512xf32>
    %cst = arith.constant 1.000000e+00 : f32
    %28 = vector.broadcast %cst : f32 to vector<1x512xf32>
    %c17_i32 = arith.constant 17 : i32
    %29 = tpu.dynamic_rotate %0 by %c17_i32 dim 1 : vector<4x512xf32>, i32 -> vector<4x512xf32>
    %30 = vector.broadcast %24 : vector<1x512xf32> to vector<4x512xf32>
    %31 = arith.mulf %29, %30 : vector<4x512xf32>
    %c0_4 = arith.constant 0 : index
    %c0_5 = arith.constant 0 : index
    %32 = vector.load %arg5[%c0_4, %c0_5] : memref<37x512xf32, #tpu.memory_space<vmem>>, vector<4x512xf32>
    tpu.vector_store %arg5[%c0_4, %c0_5], %31 {strides = array<i32>} : memref<37x512xf32, #tpu.memory_space<vmem>>, vector<4x512xf32>,
    %c16_i32 = arith.constant 16 : i32
    %33 = tpu.dynamic_rotate %0 by %c16_i32 dim 1 : vector<4x512xf32>, i32 -> vector<4x512xf32>
    %34 = vector.broadcast %11 : vector<1x512xf32> to vector<4x512xf32>
    %35 = arith.mulf %33, %34 : vector<4x512xf32>
    %c4 = arith.constant 4 : index
    %c0_6 = arith.constant 0 : index
    %36 = vector.load %arg5[%c4, %c0_6] : memref<37x512xf32, #tpu.memory_space<vmem>>, vector<4x512xf32>
    tpu.vector_store %arg5[%c4, %c0_6], %35 {strides = array<i32>} : memref<37x512xf32, #tpu.memory_space<vmem>>, vector<4x512xf32>,
    %c15_i32_7 = arith.constant 15 : i32
    %37 = tpu.dynamic_rotate %0 by %c15_i32_7 dim 1 : vector<4x512xf32>, i32 -> vector<4x512xf32>
    %38 = vector.broadcast %25 : vector<1x512xf32> to vector<4x512xf32>
    %39 = arith.mulf %37, %38 : vector<4x512xf32>
    %c8 = arith.constant 8 : index
    %c0_8 = arith.constant 0 : index
    %40 = vector.load %arg5[%c8, %c0_8] : memref<37x512xf32, #tpu.memory_space<vmem>>, vector<4x512xf32>
    tpu.vector_store %arg5[%c8, %c0_8], %39 {strides = array<i32>} : memref<37x512xf32, #tpu.memory_space<vmem>>, vector<4x512xf32>,
    %c1_i32_9 = arith.constant 1 : i32
    %41 = tpu.dynamic_rotate %0 by %c1_i32_9 dim 1 : vector<4x512xf32>, i32 -> vector<4x512xf32>
    %42 = vector.broadcast %19 : vector<1x512xf32> to vector<4x512xf32>
    %43 = arith.mulf %41, %42 : vector<4x512xf32>
    %c12 = arith.constant 12 : index
    %c0_10 = arith.constant 0 : index
    %44 = vector.load %arg5[%c12, %c0_10] : memref<37x512xf32, #tpu.memory_space<vmem>>, vector<4x512xf32>
    tpu.vector_store %arg5[%c12, %c0_10], %43 {strides = array<i32>} : memref<37x512xf32, #tpu.memory_space<vmem>>, vector<4x512xf32>,
    %c16 = arith.constant 16 : index
    %c0_11 = arith.constant 0 : index
    %45 = vector.load %arg5[%c16, %c0_11] : memref<37x512xf32, #tpu.memory_space<vmem>>, vector<4x512xf32>
    tpu.vector_store %arg5[%c16, %c0_11], %0 {strides = array<i32>} : memref<37x512xf32, #tpu.memory_space<vmem>>, vector<4x512xf32>,
    %c511_i32 = arith.constant 511 : i32
    %46 = tpu.dynamic_rotate %0 by %c511_i32 dim 1 : vector<4x512xf32>, i32 -> vector<4x512xf32>
    %47 = vector.broadcast %23 : vector<1x512xf32> to vector<4x512xf32>
    %48 = arith.mulf %46, %47 : vector<4x512xf32>
    %c20 = arith.constant 20 : index
    %c0_12 = arith.constant 0 : index
    %49 = vector.load %arg5[%c20, %c0_12] : memref<37x512xf32, #tpu.memory_space<vmem>>, vector<4x512xf32>
    tpu.vector_store %arg5[%c20, %c0_12], %48 {strides = array<i32>} : memref<37x512xf32, #tpu.memory_space<vmem>>, vector<4x512xf32>,
    %c497_i32 = arith.constant 497 : i32
    %50 = tpu.dynamic_rotate %0 by %c497_i32 dim 1 : vector<4x512xf32>, i32 -> vector<4x512xf32>
    %51 = vector.broadcast %26 : vector<1x512xf32> to vector<4x512xf32>
    %52 = arith.mulf %50, %51 : vector<4x512xf32>
    %c24 = arith.constant 24 : index
    %c0_13 = arith.constant 0 : index
    %53 = vector.load %arg5[%c24, %c0_13] : memref<37x512xf32, #tpu.memory_space<vmem>>, vector<4x512xf32>
    tpu.vector_store %arg5[%c24, %c0_13], %52 {strides = array<i32>} : memref<37x512xf32, #tpu.memory_space<vmem>>, vector<4x512xf32>,
    %c496_i32 = arith.constant 496 : i32
    %54 = tpu.dynamic_rotate %0 by %c496_i32 dim 1 : vector<4x512xf32>, i32 -> vector<4x512xf32>
    %55 = vector.broadcast %15 : vector<1x512xf32> to vector<4x512xf32>
    %56 = arith.mulf %54, %55 : vector<4x512xf32>
    %c28 = arith.constant 28 : index
    %c0_14 = arith.constant 0 : index
    %57 = vector.load %arg5[%c28, %c0_14] : memref<37x512xf32, #tpu.memory_space<vmem>>, vector<4x512xf32>
    tpu.vector_store %arg5[%c28, %c0_14], %56 {strides = array<i32>} : memref<37x512xf32, #tpu.memory_space<vmem>>, vector<4x512xf32>,
    %c495_i32 = arith.constant 495 : i32
    %58 = tpu.dynamic_rotate %0 by %c495_i32 dim 1 : vector<4x512xf32>, i32 -> vector<4x512xf32>
    %59 = vector.broadcast %27 : vector<1x512xf32> to vector<4x512xf32>
    %60 = arith.mulf %58, %59 : vector<4x512xf32>
    %c32 = arith.constant 32 : index
    %c0_15 = arith.constant 0 : index
    %61 = vector.load %arg5[%c32, %c0_15] : memref<37x512xf32, #tpu.memory_space<vmem>>, vector<4x512xf32>
    tpu.vector_store %arg5[%c32, %c0_15], %60 {strides = array<i32>} : memref<37x512xf32, #tpu.memory_space<vmem>>, vector<4x512xf32>,
    %c36 = arith.constant 36 : index
    %c0_16 = arith.constant 0 : index
    %62 = vector.load %arg5[%c36, %c0_16] : memref<37x512xf32, #tpu.memory_space<vmem>>, vector<1x512xf32>
    tpu.vector_store %arg5[%c36, %c0_16], %28 {strides = array<i32>} : memref<37x512xf32, #tpu.memory_space<vmem>>, vector<1x512xf32>,
    %c0_17 = arith.constant 0 : index
    %c0_18 = arith.constant 0 : index
    %63 = vector.load %arg2[%c0_17, %c0_18] : memref<8x37xf32, #tpu.memory_space<vmem>>, vector<8x37xf32>
    %c0_19 = arith.constant 0 : index
    %c0_20 = arith.constant 0 : index
    %64 = vector.load %arg5[%c0_19, %c0_20] : memref<37x512xf32, #tpu.memory_space<vmem>>, vector<37x512xf32>
    %cst_21 = arith.constant dense<0.000000e+00> : vector<8x512xf32>
    %65 = tpu.matmul %63, %64, %cst_21 {dimension_numbers = #tpu.dot_dimension_numbers<[1], [0], [0], [1], [0, 0, 1, 1], [], []>} : vector<8x37xf32>, vector<37x512xf32>, vector<8x512xf32> -> vector<8x512xf32>
    %cst_22 = arith.constant 0.000000e+00 : f32
    %66 = vector.broadcast %cst_22 : f32 to vector<8x512xf32>
    %67 = arith.maximumf %65, %66 : vector<8x512xf32>
    %c17_i32_23 = arith.constant 17 : i32
    %68 = tpu.dynamic_rotate %67 by %c17_i32_23 dim 1 : vector<8x512xf32>, i32 -> vector<8x512xf32>
    %69 = vector.broadcast %24 : vector<1x512xf32> to vector<8x512xf32>
    %70 = arith.mulf %68, %69 : vector<8x512xf32>
    %c0_24 = arith.constant 0 : index
    %c0_25 = arith.constant 0 : index
    %71 = vector.load %arg6[%c0_24, %c0_25] : memref<73x512xf32, #tpu.memory_space<vmem>>, vector<8x512xf32>
    tpu.vector_store %arg6[%c0_24, %c0_25], %70 {strides = array<i32>} : memref<73x512xf32, #tpu.memory_space<vmem>>, vector<8x512xf32>,
    %c16_i32_26 = arith.constant 16 : i32
    %72 = tpu.dynamic_rotate %67 by %c16_i32_26 dim 1 : vector<8x512xf32>, i32 -> vector<8x512xf32>
    %73 = vector.broadcast %11 : vector<1x512xf32> to vector<8x512xf32>
    %74 = arith.mulf %72, %73 : vector<8x512xf32>
    %c8_27 = arith.constant 8 : index
    %c0_28 = arith.constant 0 : index
    %75 = vector.load %arg6[%c8_27, %c0_28] : memref<73x512xf32, #tpu.memory_space<vmem>>, vector<8x512xf32>
    tpu.vector_store %arg6[%c8_27, %c0_28], %74 {strides = array<i32>} : memref<73x512xf32, #tpu.memory_space<vmem>>, vector<8x512xf32>,
    %c15_i32_29 = arith.constant 15 : i32
    %76 = tpu.dynamic_rotate %67 by %c15_i32_29 dim 1 : vector<8x512xf32>, i32 -> vector<8x512xf32>
    %77 = vector.broadcast %25 : vector<1x512xf32> to vector<8x512xf32>
    %78 = arith.mulf %76, %77 : vector<8x512xf32>
    %c16_30 = arith.constant 16 : index
    %c0_31 = arith.constant 0 : index
    %79 = vector.load %arg6[%c16_30, %c0_31] : memref<73x512xf32, #tpu.memory_space<vmem>>, vector<8x512xf32>
    tpu.vector_store %arg6[%c16_30, %c0_31], %78 {strides = array<i32>} : memref<73x512xf32, #tpu.memory_space<vmem>>, vector<8x512xf32>,
    %c1_i32_32 = arith.constant 1 : i32
    %80 = tpu.dynamic_rotate %67 by %c1_i32_32 dim 1 : vector<8x512xf32>, i32 -> vector<8x512xf32>
    %81 = vector.broadcast %19 : vector<1x512xf32> to vector<8x512xf32>
    %82 = arith.mulf %80, %81 : vector<8x512xf32>
    %c24_33 = arith.constant 24 : index
    %c0_34 = arith.constant 0 : index
    %83 = vector.load %arg6[%c24_33, %c0_34] : memref<73x512xf32, #tpu.memory_space<vmem>>, vector<8x512xf32>
    tpu.vector_store %arg6[%c24_33, %c0_34], %82 {strides = array<i32>} : memref<73x512xf32, #tpu.memory_space<vmem>>, vector<8x512xf32>,
    %c32_35 = arith.constant 32 : index
    %c0_36 = arith.constant 0 : index
    %84 = vector.load %arg6[%c32_35, %c0_36] : memref<73x512xf32, #tpu.memory_space<vmem>>, vector<8x512xf32>
    tpu.vector_store %arg6[%c32_35, %c0_36], %67 {strides = array<i32>} : memref<73x512xf32, #tpu.memory_space<vmem>>, vector<8x512xf32>,
    %c511_i32_37 = arith.constant 511 : i32
    %85 = tpu.dynamic_rotate %67 by %c511_i32_37 dim 1 : vector<8x512xf32>, i32 -> vector<8x512xf32>
    %86 = vector.broadcast %23 : vector<1x512xf32> to vector<8x512xf32>
    %87 = arith.mulf %85, %86 : vector<8x512xf32>
    %c40 = arith.constant 40 : index
    %c0_38 = arith.constant 0 : index
    %88 = vector.load %arg6[%c40, %c0_38] : memref<73x512xf32, #tpu.memory_space<vmem>>, vector<8x512xf32>
    tpu.vector_store %arg6[%c40, %c0_38], %87 {strides = array<i32>} : memref<73x512xf32, #tpu.memory_space<vmem>>, vector<8x512xf32>,
    %c497_i32_39 = arith.constant 497 : i32
    %89 = tpu.dynamic_rotate %67 by %c497_i32_39 dim 1 : vector<8x512xf32>, i32 -> vector<8x512xf32>
    %90 = vector.broadcast %26 : vector<1x512xf32> to vector<8x512xf32>
    %91 = arith.mulf %89, %90 : vector<8x512xf32>
    %c48 = arith.constant 48 : index
    %c0_40 = arith.constant 0 : index
    %92 = vector.load %arg6[%c48, %c0_40] : memref<73x512xf32, #tpu.memory_space<vmem>>, vector<8x512xf32>
    tpu.vector_store %arg6[%c48, %c0_40], %91 {strides = array<i32>} : memref<73x512xf32, #tpu.memory_space<vmem>>, vector<8x512xf32>,
    %c496_i32_41 = arith.constant 496 : i32
    %93 = tpu.dynamic_rotate %67 by %c496_i32_41 dim 1 : vector<8x512xf32>, i32 -> vector<8x512xf32>
    %94 = vector.broadcast %15 : vector<1x512xf32> to vector<8x512xf32>
    %95 = arith.mulf %93, %94 : vector<8x512xf32>
    %c56 = arith.constant 56 : index
    %c0_42 = arith.constant 0 : index
    %96 = vector.load %arg6[%c56, %c0_42] : memref<73x512xf32, #tpu.memory_space<vmem>>, vector<8x512xf32>
    tpu.vector_store %arg6[%c56, %c0_42], %95 {strides = array<i32>} : memref<73x512xf32, #tpu.memory_space<vmem>>, vector<8x512xf32>,
    %c495_i32_43 = arith.constant 495 : i32
    %97 = tpu.dynamic_rotate %67 by %c495_i32_43 dim 1 : vector<8x512xf32>, i32 -> vector<8x512xf32>
    %98 = vector.broadcast %27 : vector<1x512xf32> to vector<8x512xf32>
    %99 = arith.mulf %97, %98 : vector<8x512xf32>
    %c64 = arith.constant 64 : index
    %c0_44 = arith.constant 0 : index
    %100 = vector.load %arg6[%c64, %c0_44] : memref<73x512xf32, #tpu.memory_space<vmem>>, vector<8x512xf32>
    tpu.vector_store %arg6[%c64, %c0_44], %99 {strides = array<i32>} : memref<73x512xf32, #tpu.memory_space<vmem>>, vector<8x512xf32>,
    %c72 = arith.constant 72 : index
    %c0_45 = arith.constant 0 : index
    %101 = vector.load %arg6[%c72, %c0_45] : memref<73x512xf32, #tpu.memory_space<vmem>>, vector<1x512xf32>
    tpu.vector_store %arg6[%c72, %c0_45], %28 {strides = array<i32>} : memref<73x512xf32, #tpu.memory_space<vmem>>, vector<1x512xf32>,
    %c0_46 = arith.constant 0 : index
    %c0_47 = arith.constant 0 : index
    %102 = vector.load %arg3[%c0_46, %c0_47] : memref<4x73xf32, #tpu.memory_space<vmem>>, vector<4x73xf32>
    %c0_48 = arith.constant 0 : index
    %c0_49 = arith.constant 0 : index
    %103 = vector.load %arg6[%c0_48, %c0_49] : memref<73x512xf32, #tpu.memory_space<vmem>>, vector<73x512xf32>
    %cst_50 = arith.constant dense<0.000000e+00> : vector<4x512xf32>
    %104 = tpu.matmul %102, %103, %cst_50 {dimension_numbers = #tpu.dot_dimension_numbers<[1], [0], [0], [1], [0, 0, 1, 1], [], []>} : vector<4x73xf32>, vector<73x512xf32>, vector<4x512xf32> -> vector<4x512xf32>
    %cst_51 = arith.constant 1.000000e+00 : f32
    %105 = vector.broadcast %cst_51 : f32 to vector<4x512xf32>
    %106 = arith.mulf %0, %105 : vector<4x512xf32>
    %107 = arith.addf %106, %104 : vector<4x512xf32>
    %c0_52 = arith.constant 0 : index
    %c0_53 = arith.constant 0 : index
    %108 = vector.load %arg4[%c0_52, %c0_53] : memref<4x512xf32, #tpu.memory_space<vmem>>, vector<4x512xf32>
    tpu.vector_store %arg4[%c0_52, %c0_53], %107 {strides = array<i32>} : memref<4x512xf32, #tpu.memory_space<vmem>>, vector<4x512xf32>,
    return
  }
  func.func @transform_0(%arg0: i32) -> (i32, i32) {
    %c0_i32 = arith.constant 0 : i32
    %c0_i32_0 = arith.constant 0 : i32
    return %c0_i32, %arg0 : i32, i32
  }
  func.func @transform_1(%arg0: i32) -> (i32, i32) {
    %c0_i32 = arith.constant 0 : i32
    %c0_i32_0 = arith.constant 0 : i32
    %c0_i32_1 = arith.constant 0 : i32
    return %c0_i32, %c0_i32_0 : i32, i32
  }
  func.func @transform_2(%arg0: i32) -> (i32, i32) {
    %c0_i32 = arith.constant 0 : i32
    %c0_i32_0 = arith.constant 0 : i32
    %c0_i32_1 = arith.constant 0 : i32
    return %c0_i32, %c0_i32_0 : i32, i32
  }
  func.func @transform_3(%arg0: i32) -> (i32, i32) {
    %c0_i32 = arith.constant 0 : i32
    %c0_i32_0 = arith.constant 0 : i32
    return %c0_i32, %arg0 : i32, i32
  }
}

</mosaic_0001>

<bundles_post_ra>
// kernel: tpu_custom_call.1
= control target key start
LH: loop header
LB: loop body
LE: loop exit
PB: predicated region body
PF: predicated region fallthrough
CT: control target
= control target key end

     0   :  { %8 = vsyncpa [#allocation5], 0  ;;  %s1684_s0 = inlined_call_operand.hbm [shape: f32[4,512], index: 0, kind: input, shape index: {}]   ;;  %s1685_s1 = inlined_call_operand.hbm [shape: f32[8,37], index: 1, kind: input, shape index: {}]   ;;  %s1686_s2 = inlined_call_operand.vmem [shape: f32[4,73], index: 2, kind: input, shape index: {}]   ;;  %s1687_s3 = inlined_call_operand.hbm [shape: f32[4,512], index: 3, kind: output, shape index: {}]  }
   0x1   :  { %9 = vsyncpa [#allocation8], 0 }
   0x2   :  { %10 = vsyncpa [#allocation6], 0  ;;  %s1110_s12 = smov [#allocation4]   ;;  %s1111_s14 = smov [#allocation7]  }
   0x3   :  { %s17_s13 = sshll.u32 %s1110_s12, 4  ;;  %s27_s15 = sshll.u32 %s1111_s14, 4  ;;  %s18_s13 = int_to_ptr.vmem [resolvable:$true] %s17_s13  ;;  %s28_s15 = int_to_ptr.vmem [resolvable:$true] %s27_s15 }
   0x4   :  { %s1038_s18 = scalar_lea.hbm %s1684_s0, 256 }
   0x5   :  { %p1039_p0 = scmp.ne.s32.totalorder %s1684_s0, %s1038_s18  ;;  %p1042_p1 = scmp.lt.u32.totalorder %s1038_s18, %s1684_s0 }
   0x7   :  { %p1044_p2 = pnand %p1042_p1, %p1039_p0 }
   0x9   :  { %1047 = shalt.err (!%p1044_p2)
}
   0xa   :  { %s1048_s23 = scalar_lea.vmem %s18_s13, 256  ;;  %p1053_p4 = scmp.lt.s32.totalorder %s18_s13, %s18_s13 }
   0xb   :  { %p1049_p3 = scmp.ne.s32.totalorder %s18_s13, %s1048_s23  ;;  %p1054_p5 = scmp.lt.s32.totalorder %s1048_s23, %s1048_s23 }
   0xd   :  { %p1055_p6 = por %p1054_p5, %p1053_p4 }
   0xf   :  { %p1056_p7 = pnand %p1055_p6, %p1049_p3 }
  0x11   :  { %1059 = shalt.err (!%p1056_p7)
}
  0x12   :  { %20 = dma.hbm_to_vmem [thread:$0]  %s1684_s0, 256, %s18_s13, [#allocation5]  }
  0x13   :  { %s1060_s28 = scalar_lea.hbm %s1685_s1, 128 }
  0x14   :  { %p1061_p8 = scmp.ne.s32.totalorder %s1685_s1, %s1060_s28  ;;  %p1064_p9 = scmp.lt.u32.totalorder %s1060_s28, %s1685_s1 }
  0x16   :  { %p1066_p10 = pnand %p1064_p9, %p1061_p8 }
  0x18   :  { %1069 = shalt.err (!%p1066_p10)
}
  0x19   :  { %s1070_s6 = scalar_lea.vmem %s28_s15, 128  ;;  %p1075_p12 = scmp.lt.s32.totalorder %s28_s15, %s28_s15 }
  0x1a   :  { %p1071_p11 = scmp.ne.s32.totalorder %s28_s15, %s1070_s6  ;;  %p1076_p13 = scmp.lt.s32.totalorder %s1070_s6, %s1070_s6 }
  0x1c   :  { %p1077_p0 = por %p1076_p13, %p1075_p12 }
  0x1e   :  { %p1078_p1 = pnand %p1077_p0, %p1071_p11 }
  0x20   :  { %1081 = shalt.err (!%p1078_p1)
}
  0x21   :  { %30 = dma.hbm_to_vmem [thread:$0]  %s1685_s1, 128, %s28_s15, [#allocation8]  }
  0x22   :  { %1104 = dma.done.wait [#allocation5], 256  }
  0x23   :  { %1105 = vsyncadd [#allocation5], 4294967040 }
  0x24   :  { %1106 = dma.done.wait [#allocation8], 128  }
  0x25   :  { %1107 = vsyncadd [#allocation8], 4294967168  ;;  %v1112_v0 = vmov 0.0   ;;  %v1170_v1 = vld [vmem:[#allocation4 + $0x8] sm:$0xff]  ;;  %v1172_v2 = vld [vmem:[#allocation4] sm:$0xff]  ;;  %s1113_s8 = smov 16   ;;  %v41_v5 = vlaneseq }
  0x26   :  { %457 = vmatprep.mubr.f32.mxu0 %v1112_v0  ;;  %528 = vmatprep.mubr.f32.mxu1 %v1112_v0  ;;  %238 = vst [vmem:[#allocation2 + $0x50] sm:$0xf] %v1170_v1  ;;  %236 = vst [vmem:[#allocation2 + $0x40] sm:$0xf] %v1172_v2  ;;  %v125_v3 = vcombine.high %v1170_v1, %v1170_v1  ;;  %v124_v4 = vcombine.high %v1172_v2, %v1172_v2  ;;  %s1114_s1 = smov 1   ;;  %s1115_s9 = smov 17  }
  0x27   :  { %153 = vrot.lane.b32.xlu1 %v1170_v1, %s1113_s8  ;;  %149 = vrot.lane.b32.xlu0 %v1172_v2, %s1113_s8  ;;  %s1116_s10 = smov 15   ;;  %s1117_s11 = smov 127   ;;  %vm350_vm0 = vcmp.lt.s32.totalorder %v41_v5, 512  ;;  %v1119_v6 = vmov 1.0   ;;  %v1228_v7 = vand.u32 127, %v41_v5 }
  0x28   :  { %239 = vst [vmem:[#allocation2 + $0x58] sm:$0xf] %v125_v3  ;;  %237 = vst [vmem:[#allocation2 + $0x48] sm:$0xf] %v124_v4  ;;  %s1118_s12 = smov 112   ;;  %s1120_s13 = smov 113  }
  0x29   :  { %353 = vst.msk [vmem:[#allocation2 + $0x84] ss:$8 sm:$0xf] %vm350_vm0, %v1119_v6  ;;  %704 = vst.msk [vmem:[#allocation3 + $0x120] ss:$8 sm:$0xf] %vm350_vm0, %v1119_v6 }
  0x2a   :  { %s1121_s14 = smov 111   ;;  %v1231_v8 = vadd.s32 384, %v1228_v7  ;;  %v50_v9 = vshra.s32 %v1228_v7, 4  ;;  %v1236_v11 = vadd.s32 128, %v1228_v7  ;;  %v1239_v12 = vadd.s32 256, %v1228_v7  ;;  %s1123_s17 = smov [#allocation9]  }
  0x2b   :  { %155 = vrot.lane.b32.xlu1 %v125_v3, %s1113_s8  ;;  %203 = vrot.lane.b32.xlu0 %v1172_v2, %s1114_s1  ;;  %vm157_vm3 = vcmp.lt.s32.totalorder %v1228_v7, 16  ;;  %v46_v24 = vand.u32 15, %v1228_v7  ;;  %vm211_vm7 = vcmp.lt.s32.totalorder %v1228_v7, 1  ;;  %vm136_vm11 = vcmp.lt.s32.totalorder %v1228_v7, 17  ;;  %s924_s18 = sshll.u32 %s1123_s17, 4  ;;  %s925_s18 = int_to_ptr.vmem [resolvable:$true] %s924_s18 }
  0x2c   :  { %v53_v10 = vshra.s32 %v1231_v8, 4  ;;  %v1241_v13 = vand.u32 15, %v50_v9  ;;  %v51_v15 = vshra.s32 %v1236_v11, 4  ;;  %v52_v16 = vshra.s32 %v1239_v12, 4  ;;  %p1087_p3 = scmp.lt.s32.totalorder %s925_s18, %s925_s18 }
  0x2d   :  { %v47_v17 = vand.u32 15, %v1236_v11  ;;  %v48_v25 = vand.u32 15, %v1239_v12  ;;  %v49_v28 = vand.u32 15, %v1231_v8  ;;  %vm82_vm8 = vcmp.ge.s32.totalorder %v46_v24, 1 }
  0x2e   :  { %v1243_v14 = vand.u32 15, %v53_v10  ;;  %vm58_vm1 = vcmp.ge.s32.totalorder %v1241_v13, 1  ;;  %v1250_v20 = vand.u32 15, %v51_v15  ;;  %v1252_v21 = vand.u32 15, %v52_v16 }
  0x2f   :  { %205 = vrot.lane.b32.xlu1 %v124_v4, %s1114_s1  ;;  %151 = vrot.lane.b32.xlu0 %v124_v4, %s1113_s8  ;;  %v1256_v22 = vsel %vm58_vm1, 1.0, %v1112_v0  ;;  %vm83_vm4 = vcmp.ge.s32.totalorder %v47_v17, 1  ;;  %vm84_vm9 = vcmp.ge.s32.totalorder %v48_v25, 1  ;;  %vm85_vm10 = vcmp.ge.s32.totalorder %v49_v28, 1 }
  0x30   :  { %vm61_vm2 = vcmp.ge.s32.totalorder %v1243_v14, 1  ;;  %vm59_vm5 = vcmp.ge.s32.totalorder %v1250_v20, 1  ;;  %vm60_vm6 = vcmp.ge.s32.totalorder %v1252_v21, 1  ;;  %v1274_v33 = vsel %vm83_vm4, 1.0, %v1112_v0 }
  0x31   :  { %v1259_v23 = vsel %vm61_vm2, 1.0, %v1112_v0  ;;  %v1277_v34 = vsel %vm59_vm5, 1.0, %v1112_v0  ;;  %v1280_v35 = vsel %vm60_vm6, 1.0, %v1112_v0  ;;  %v1296_v46 = vsel %vm82_vm8, 1.0, %v1112_v0 }
  0x32   :  { %v1299_v47 = vsel %vm84_vm9, 1.0, %v1112_v0  ;;  %v1302_v48 = vsel %vm85_vm10, 1.0, %v1112_v0  ;;  %v1312_v57 = vmul.f32 %v1274_v33, %v1277_v34  ;;  %vm95_vm12 = vcmp.le.s32.totalorder %v47_v17, 14 }
  0x33   :  { %209 = vrot.lane.b32.xlu1 %v125_v3, %s1114_s1  ;;  %207 = vrot.lane.b32.xlu0 %v1170_v1, %s1114_s1  ;;  %v1322_v6 = vmul.f32 %v1296_v46, %v1256_v22  ;;  %v1327_v9 = vmul.f32 %v1299_v47, %v1280_v35  ;;  %v1331_v10 = vmul.f32 %v1302_v48, %v1259_v23  ;;  %v1334_v11 = vsel %vm95_vm12, 1.0, %v1112_v0 }
  0x34   :  { %vm94_vm13 = vcmp.le.s32.totalorder %v46_v24, 14  ;;  %vm96_vm14 = vcmp.le.s32.totalorder %v48_v25, 14  ;;  %vm97_vm15 = vcmp.le.s32.totalorder %v49_v28, 14  ;;  %vm190_vm0 = vcmp.lt.s32.totalorder %v1228_v7, 15 }
  0x35   :  { %v1355_v25 = vsel %vm94_vm13, 1.0, %v1112_v0  ;;  %v1358_v28 = vsel %vm96_vm14, 1.0, %v1112_v0  ;;  %vm248_vm1 = vcmp.lt.s32.totalorder %v1228_v7, 127  ;;  %vm70_vm2 = vcmp.le.s32.totalorder %v1241_v13, 14 }
  0x36   :  { %vm302_vm4 = vcmp.lt.s32.totalorder %v1228_v7, 112  ;;  %vm73_vm5 = vcmp.le.s32.totalorder %v1243_v14, 14  ;;  %vm71_vm6 = vcmp.le.s32.totalorder %v1250_v20, 14  ;;  %vm72_vm8 = vcmp.le.s32.totalorder %v1252_v21, 14 }
  0x37   :  { %130 = vrot.lane.b32.xlu1 %v124_v4, %s1115_s9  ;;  %128 = vrot.lane.b32.xlu0 %v1172_v2, %s1115_s9  ;;  %vm281_vm9 = vcmp.lt.s32.totalorder %v1228_v7, 113  ;;  %vm335_vm10 = vcmp.lt.s32.totalorder %v1228_v7, 111  ;;  %vm380_vm12 = vcmask 1044480   ;;  %vm376_vm13 = vcmask 302080   ;;  %v706_v7 = vld [vmem:[%s1686_s2] sm:$0xf] }
  0x38   :  { %vm747_vm14 = vcmask 596992   ;;  %s1082_s2 = scalar_lea.vmem %s925_s18, 256 }
  0x39   :  { %p1083_p2 = scmp.ne.s32.totalorder %s925_s18, %s1082_s2  ;;  %p1088_p4 = scmp.lt.s32.totalorder %s1082_s2, %s1082_s2 }
  0x3b   :  { %134 = vrot.lane.b32.xlu1 %v125_v3, %s1115_s9  ;;  %132 = vrot.lane.b32.xlu0 %v1170_v1, %s1115_s9  ;;  %p1089_p5 = por %p1088_p4, %p1087_p3 }
  0x3d   :  { %p1090_p6 = pnand %p1089_p5, %p1083_p2 }
  0x3f   :  { %184 = vrot.lane.b32.xlu1 %v124_v4, %s1116_s10  ;;  %182 = vrot.lane.b32.xlu0 %v1172_v2, %s1116_s10 }
  0x43   :  { %188 = vrot.lane.b32.xlu1 %v125_v3, %s1116_s10  ;;  %186 = vrot.lane.b32.xlu0 %v1170_v1, %s1116_s10 }
  0x47   :  { %242 = vrot.lane.b32.xlu1 %v124_v4, %s1117_s11  ;;  %240 = vrot.lane.b32.xlu0 %v1172_v2, %s1117_s11 }
  0x4b   :  { %246 = vrot.lane.b32.xlu1 %v125_v3, %s1117_s11  ;;  %244 = vrot.lane.b32.xlu0 %v1170_v1, %s1117_s11 }
  0x4f   :  { %296 = vrot.lane.b32.xlu1 %v124_v4, %s1118_s12  ;;  %294 = vrot.lane.b32.xlu0 %v1172_v2, %s1118_s12 }
  0x53   :  { %300 = vrot.lane.b32.xlu1 %v125_v3, %s1118_s12  ;;  %298 = vrot.lane.b32.xlu0 %v1170_v1, %s1118_s12 }
  0x57   :  { %275 = vrot.lane.b32.xlu1 %v124_v4, %s1120_s13  ;;  %273 = vrot.lane.b32.xlu0 %v1172_v2, %s1120_s13 }
  0x5b   :  { %279 = vrot.lane.b32.xlu1 %v125_v3, %s1120_s13  ;;  %277 = vrot.lane.b32.xlu0 %v1170_v1, %s1120_s13 }
  0x5f   :  { %329 = vrot.lane.b32.xlu1 %v124_v4, %s1121_s14  ;;  %327 = vrot.lane.b32.xlu0 %v1172_v2, %s1121_s14 }
  0x63   :  { %333 = vrot.lane.b32.xlu1 %v125_v3, %s1121_s14  ;;  %331 = vrot.lane.b32.xlu0 %v1170_v1, %s1121_s14 }
  0x99   :  { %v154_v18 = vpop.permute.xlu1 %153  ;;  %v150_v19 = vpop.permute.xlu0 %149 }
  0x9d   :  { %v156_v26 = vpop.permute.xlu1 %155  ;;  %v204_v27 = vpop.permute.xlu0 %203 }
  0x9e   :  { %v158_v29 = vsel %vm157_vm3, %v154_v18, %v156_v26  ;;  %v161_v30 = vsel %vm157_vm3, %v156_v26, %v150_v19  ;;  %v1348_v26 = vmul.f32 %v1334_v11, %v1277_v34 }
  0x9f   :  { %v162_v31 = vmul.f32 %v1256_v22, %v161_v30  ;;  %v165_v32 = vmul.f32 %v1259_v23, %v158_v29  ;;  %v1361_v29 = vsel %vm97_vm15, 1.0, %v1112_v0 }
  0xa1   :  { %v170_v36 = vrot.slane %v162_v31, 4  ;;  %v173_v37 = vrot.slane %v165_v32, 4  ;;  %v206_v38 = vpop.permute.xlu1 %205  ;;  %v152_v39 = vpop.permute.xlu0 %151 }
  0xa2   :  { %v214_v40 = vsel %vm211_vm7, %v204_v27, %v206_v38  ;;  %v159_v41 = vsel %vm157_vm3, %v152_v39, %v154_v18  ;;  %v160_v42 = vsel %vm157_vm3, %v150_v19, %v152_v39  ;;  %v1376_v39 = vmul.f32 %v1361_v29, %v1259_v23 }
  0xa3   :  { %178 = vst [vmem:[#allocation2] sm:$0xf0] %v170_v36  ;;  %181 = vst [vmem:[#allocation2 + $0x18] sm:$0xf0] %v173_v37  ;;  %v217_v43 = vmul.f32 %v1274_v33, %v214_v40  ;;  %v163_v44 = vmul.f32 %v1277_v34, %v160_v42  ;;  %v164_v45 = vmul.f32 %v1280_v35, %v159_v41 }
  0xa4   :  { %v1368_v37 = vmul.f32 %v1355_v25, %v1256_v22 }
  0xa5   :  { %v225_v49 = vrot.slane %v217_v43, 4  ;;  %v171_v50 = vrot.slane %v163_v44, 4  ;;  %v172_v51 = vrot.slane %v164_v45, 4  ;;  %v210_v52 = vpop.permute.xlu1 %209  ;;  %v208_v53 = vpop.permute.xlu0 %207 }
  0xa6   :  { %v215_v54 = vsel %vm211_vm7, %v210_v52, %v204_v27  ;;  %v212_v55 = vsel %vm211_vm7, %v208_v53, %v210_v52  ;;  %v213_v56 = vsel %vm211_vm7, %v206_v38, %v208_v53  ;;  %v1372_v38 = vmul.f32 %v1358_v28, %v1280_v35 }
  0xa7   :  { %233 = vst [vmem:[#allocation2 + $0x28] sm:$0xf0] %v225_v49  ;;  %179 = vst [vmem:[#allocation2 + $0x8] sm:$0xf0] %v171_v50  ;;  %v216_v58 = vmul.f32 %v1296_v46, %v215_v54  ;;  %v218_v59 = vmul.f32 %v1299_v47, %v213_v56  ;;  %v219_v60 = vmul.f32 %v1302_v48, %v212_v55 }
  0xa8   :  { %180 = vst [vmem:[#allocation2 + $0x10] sm:$0xf0] %v172_v51 }
  0xa9   :  { %v224_v61 = vrot.slane %v216_v58, 4  ;;  %v226_v62 = vrot.slane %v218_v59, 4  ;;  %v227_v63 = vrot.slane %v219_v60, 4  ;;  %v131_v3 = vpop.permute.xlu1 %130  ;;  %v129_v4 = vpop.permute.xlu0 %128 }
  0xaa   :  { %v139_v5 = vsel %vm136_vm11, %v129_v4, %v131_v3 }
  0xab   :  { %232 = vst [vmem:[#allocation2 + $0x20] sm:$0xf0] %v224_v61  ;;  %234 = vst [vmem:[#allocation2 + $0x30] sm:$0xf0] %v226_v62  ;;  %v142_v8 = vmul.f32 %v139_v5, %v1312_v57 }
  0xac   :  { %235 = vst [vmem:[#allocation2 + $0x38] sm:$0xf0] %v227_v63 }
  0xad   :  { %146 = vst [vmem:[#allocation2 + $0x8] sm:$0xf] %v142_v8  ;;  %v135_v15 = vpop.permute.xlu1 %134  ;;  %v133_v16 = vpop.permute.xlu0 %132  ;;  %v1403_v8 = vsel %vm70_vm2, 1.0, %v1112_v0 }
  0xae   :  { %v140_v17 = vsel %vm136_vm11, %v135_v15, %v129_v4  ;;  %v137_v18 = vsel %vm136_vm11, %v133_v16, %v135_v15  ;;  %v138_v19 = vsel %vm136_vm11, %v131_v3, %v133_v16 }
  0xaf   :  { %v141_v27 = vmul.f32 %v140_v17, %v1322_v6  ;;  %v143_v24 = vmul.f32 %v138_v19, %v1327_v9  ;;  %v144_v12 = vmul.f32 %v137_v18, %v1331_v10 }
  0xb1   :  { %145 = vst [vmem:[#allocation2] sm:$0xf] %v141_v27  ;;  %147 = vst [vmem:[#allocation2 + $0x10] sm:$0xf] %v143_v24  ;;  %v185_v30 = vpop.permute.xlu1 %184  ;;  %v183_v31 = vpop.permute.xlu0 %182 }
  0xb2   :  { %148 = vst [vmem:[#allocation2 + $0x18] sm:$0xf] %v144_v12  ;;  %v193_v32 = vsel %vm190_vm0, %v183_v31, %v185_v30 }
  0xb3   :  { %v196_v36 = vmul.f32 %v193_v32, %v1348_v26 }
  0xb4   :  { %v357_v55 = vld [vmem:[#allocation2 + $0x8] sm:$0xff] }
  0xb5   :  { %200 = vst [vmem:[#allocation2 + $0x28] sm:$0xf] %v196_v36  ;;  %v189_v40 = vpop.permute.xlu1 %188  ;;  %v187_v41 = vpop.permute.xlu0 %186 }
  0xb6   :  { %v194_v42 = vsel %vm190_vm0, %v189_v40, %v183_v31  ;;  %v191_v43 = vsel %vm190_vm0, %v187_v41, %v189_v40  ;;  %v192_v44 = vsel %vm190_vm0, %v185_v30, %v187_v41 }
  0xb7   :  { %v195_v45 = vmul.f32 %v194_v42, %v1368_v37  ;;  %v197_v49 = vmul.f32 %v192_v44, %v1372_v38  ;;  %v198_v50 = vmul.f32 %v191_v43, %v1376_v39  ;;  %v1414_v44 = vsel %vm73_vm5, 1.0, %v1112_v0 }
  0xb8   :  { %v356_v15 = vld [vmem:[#allocation2] sm:$0xff]  ;;  %v358_v36 = vld [vmem:[#allocation2 + $0x10] sm:$0xff] }
  0xb9   :  { %199 = vst [vmem:[#allocation2 + $0x20] sm:$0xf] %v195_v45  ;;  %201 = vst [vmem:[#allocation2 + $0x30] sm:$0xf] %v197_v49  ;;  %v243_v51 = vpop.permute.xlu1 %242  ;;  %v241_v52 = vpop.permute.xlu0 %240  ;;  %v359_v32 = vld [vmem:[#allocation2 + $0x18] sm:$0xff]  ;;  %v1419_v45 = vsel %vm71_vm6, 1.0, %v1112_v0 }
  0xba   :  { %202 = vst [vmem:[#allocation2 + $0x38] sm:$0xf] %v198_v50  ;;  %v251_v53 = vsel %vm248_vm1, %v241_v52, %v243_v51  ;;  %v1424_v49 = vsel %vm72_vm8, 1.0, %v1112_v0 }
  0xbb   :  { %v253_v54 = vmul.f32 %v1355_v25, %v251_v53 }
  0xbc   :  { %v361_v56 = vld [vmem:[#allocation2 + $0x28] sm:$0xff] }
  0xbd   :  { %v261_v58 = vrot.slane %v253_v54, 4  ;;  %v247_v59 = vpop.permute.xlu1 %246  ;;  %v245_v60 = vpop.permute.xlu0 %244  ;;  %v962_v61 = vpack.c.bf16 %v361_v56, %v357_v55  ;;  %v1434_v54 = vmul.f32 %v1296_v46, %v1403_v8 }
  0xbe   :  { %v252_v62 = vsel %vm248_vm1, %v247_v59, %v241_v52  ;;  %v249_v63 = vsel %vm248_vm1, %v245_v60, %v247_v59  ;;  %v250_v3 = vsel %vm248_vm1, %v243_v51, %v245_v60 }
  0xbf   :  { %269 = vst [vmem:[#allocation2 + $0x40] sm:$0xf0] %v261_v58  ;;  %v256_v4 = vmul.f32 %v1361_v29, %v252_v62  ;;  %v254_v13 = vmul.f32 %v1334_v11, %v250_v3  ;;  %v255_v5 = vmul.f32 %v1358_v28, %v249_v63  ;;  %963 = vmatprep.subr.bf16.mxu0 %v962_v61 }
  0xc0   :  { %v360_v16 = vld [vmem:[#allocation2 + $0x20] sm:$0xff]  ;;  %v362_v18 = vld [vmem:[#allocation2 + $0x30] sm:$0xff] }
  0xc1   :  { %v363_v17 = vld [vmem:[#allocation2 + $0x38] sm:$0xff]  ;;  %v264_v19 = vrot.slane %v256_v4, 4  ;;  %v262_v27 = vrot.slane %v254_v13, 4  ;;  %v263_v24 = vrot.slane %v255_v5, 4  ;;  %v297_v12 = vpop.permute.xlu1 %296  ;;  %v295_v30 = vpop.permute.xlu0 %294  ;;  %v964_v31 = vpack.c.bf16 %v360_v16, %v356_v15 }
  0xc2   :  { %v305_v40 = vsel %vm302_vm4, %v295_v30, %v297_v12  ;;  %v970_v41 = vpack.c.bf16 %v363_v17, %v359_v32  ;;  %v972_v42 = vpack.c.bf16 %v362_v18, %v358_v36  ;;  %v1445_v4 = vmul.f32 %v1302_v48, %v1414_v44 }
  0xc3   :  { %272 = vst [vmem:[#allocation2 + $0x58] sm:$0xf0] %v264_v19  ;;  %270 = vst [vmem:[#allocation2 + $0x48] sm:$0xf0] %v262_v27  ;;  %v307_v43 = vmul.f32 %v1403_v8, %v305_v40  ;;  %965 = vmatpush1.bf16.msra.mxu0 %v964_v31  ;;  %v1449_v13 = vmul.f32 %v1274_v33, %v1419_v45  ;;  %v1453_v5 = vmul.f32 %v1299_v47, %v1424_v49 }
  0xc4   :  { %271 = vst [vmem:[#allocation2 + $0x50] sm:$0xf0] %v263_v24  ;;  %971 = vmatprep.subr.bf16.mxu1 %v970_v41  ;;  %v1463_v27 = vmul.f32 %v1355_v25, %v1403_v8  ;;  %v1474_v41 = vmul.f32 %v1361_v29, %v1414_v44 }
  0xc5   :  { %v315_v50 = vrot.slane %v307_v43, 4  ;;  %973 = vmatpush1.bf16.msra.mxu1 %v972_v42  ;;  %v301_v51 = vpop.permute.xlu1 %300  ;;  %v299_v52 = vpop.permute.xlu0 %298  ;;  %v1478_v42 = vmul.f32 %v1334_v11, %v1419_v45  ;;  %v1482_v43 = vmul.f32 %v1358_v28, %v1424_v49 }
  0xc6   :  { %v306_v53 = vsel %vm302_vm4, %v301_v51, %v295_v30  ;;  %v303_v14 = vsel %vm302_vm4, %v299_v52, %v301_v51  ;;  %v304_v20 = vsel %vm302_vm4, %v297_v12, %v299_v52 }
  0xc7   :  { %323 = vst [vmem:[#allocation2 + $0x60] sm:$0xf0] %v315_v50  ;;  %v310_v21 = vmul.f32 %v1414_v44, %v306_v53  ;;  %v308_v55 = vmul.f32 %v1419_v45, %v304_v20  ;;  %v309_v56 = vmul.f32 %v1424_v49, %v303_v14 }
  0xc9   :  { %v318_v58 = vrot.slane %v310_v21, 4  ;;  %v316_v59 = vrot.slane %v308_v55, 4  ;;  %v317_v60 = vrot.slane %v309_v56, 4  ;;  %v276_v61 = vpop.permute.xlu1 %275  ;;  %v274_v62 = vpop.permute.xlu0 %273 }
  0xca   :  { %v284_v63 = vsel %vm281_vm9, %v274_v62, %v276_v61  ;;  %v365_v20 = vld [vmem:[#allocation2 + $0x48] sm:$0xff] }
  0xcb   :  { %326 = vst [vmem:[#allocation2 + $0x78] sm:$0xf0] %v318_v58  ;;  %324 = vst [vmem:[#allocation2 + $0x68] sm:$0xf0] %v316_v59  ;;  %v286_v3 = vmul.f32 %v284_v63, %v1434_v54  ;;  %v367_v58 = vld [vmem:[#allocation2 + $0x58] sm:$0xff] }
  0xcc   :  { %325 = vst [vmem:[#allocation2 + $0x70] sm:$0xf0] %v317_v60  ;;  %v366_v60 = vld [vmem:[#allocation2 + $0x50] sm:$0xff] }
  0xcd   :  { %290 = vst [vmem:[#allocation2 + $0x60] sm:$0xf] %v286_v3  ;;  %v280_v15 = vpop.permute.xlu1 %279  ;;  %v278_v16 = vpop.permute.xlu0 %277 }
  0xce   :  { %v285_v17 = vsel %vm281_vm9, %v280_v15, %v274_v62  ;;  %v282_v18 = vsel %vm281_vm9, %v278_v16, %v280_v15  ;;  %v283_v19 = vsel %vm281_vm9, %v276_v61, %v278_v16  ;;  %v364_v16 = vld [vmem:[#allocation2 + $0x40] sm:$0xff] }
  0xcf   :  { %v289_v24 = vmul.f32 %v285_v17, %v1445_v4  ;;  %v287_v12 = vmul.f32 %v283_v19, %v1449_v13  ;;  %v288_v30 = vmul.f32 %v282_v18, %v1453_v5  ;;  %v355_v19 = vld [vmem:[#allocation7] sm:$0xff] }
  0xd1   :  { %293 = vst [vmem:[#allocation2 + $0x78] sm:$0xf] %v289_v24  ;;  %291 = vst [vmem:[#allocation2 + $0x68] sm:$0xf] %v287_v12  ;;  %v330_v31 = vpop.permute.xlu1 %329  ;;  %v328_v32 = vpop.permute.xlu0 %327 }
  0xd2   :  { %292 = vst [vmem:[#allocation2 + $0x70] sm:$0xf] %v288_v30  ;;  %v338_v36 = vsel %vm335_vm10, %v328_v32, %v330_v31 }
  0xd3   :  { %v340_v40 = vmul.f32 %v338_v36, %v1463_v27 }
  0xd4   :  { %v368_v59 = vld [vmem:[#allocation2 + $0x60] sm:$0xff] }
  0xd5   :  { %344 = vst [vmem:[#allocation2 + $0x80] sm:$0xf] %v340_v40  ;;  %v334_v50 = vpop.permute.xlu1 %333  ;;  %v332_v51 = vpop.permute.xlu0 %331  ;;  %v968_v18 = vpack.c.bf16 %v368_v59, %v364_v16 }
  0xd6   :  { %v339_v52 = vsel %vm335_vm10, %v334_v50, %v328_v32  ;;  %v336_v53 = vsel %vm335_vm10, %v332_v51, %v334_v50  ;;  %v337_v14 = vsel %vm335_vm10, %v330_v31, %v332_v51 }
  0xd7   :  { %v343_v21 = vmul.f32 %v339_v52, %v1474_v41  ;;  %v341_v55 = vmul.f32 %v337_v14, %v1478_v42  ;;  %v342_v56 = vmul.f32 %v336_v53, %v1482_v43 }
  0xd8   :  { %v369_v61 = vld [vmem:[#allocation2 + $0x68] sm:$0xff]  ;;  %v371_v62 = vld [vmem:[#allocation2 + $0x78] sm:$0xff] }
  0xd9   :  { %v370_v63 = vld [vmem:[#allocation2 + $0x70] sm:$0xff]  ;;  %347 = vst [vmem:[#allocation2 + $0x98] sm:$0xf] %v343_v21  ;;  %345 = vst [vmem:[#allocation2 + $0x88] sm:$0xf] %v341_v55  ;;  %v966_v3 = vpack.c.bf16 %v369_v61, %v365_v20  ;;  %v974_v15 = vpack.c.bf16 %v371_v62, %v367_v58 }
  0xda   :  { %346 = vst [vmem:[#allocation2 + $0x90] sm:$0xf] %v342_v56  ;;  %v976_v17 = vpack.c.bf16 %v370_v63, %v366_v60 }
  0xdb   :  { %967 = vmatprep.subr.bf16.mxu0 %v966_v3  ;;  %975 = vmatprep.subr.bf16.mxu1 %v974_v15 }
  0xdc   :  { %969 = vmatpush1.bf16.msra.mxu0 %v968_v18  ;;  %977 = vmatpush1.bf16.msra.mxu1 %v976_v17  ;;  %v372_v31 = vld [vmem:[#allocation2 + $0x80] sm:$0x1f] }
  0xe0   :  { %v373_v24 = vld [vmem:[#allocation2 + $0x88] sm:$0x1f]  ;;  %v375_v12 = vld [vmem:[#allocation2 + $0x98] sm:$0x1f] }
  0xe1   :  { %v374_v30 = vld [vmem:[#allocation2 + $0x90] sm:$0x1f]  ;;  %950 = vmatprep.subr.msk.mxu0 %vm380_vm12, %v373_v24  ;;  %953 = vmatprep.subr.msk.mxu1 %vm380_vm12, %v375_v12 }
  0xe2   :  { %951 = vmatpush1.msk.msra.mxu0 %vm380_vm12, %v372_v31  ;;  %954 = vmatpush1.msk.msra.mxu1 %vm380_vm12, %v374_v30 }
  0xe3   :  { %952 = vmatmul.mubr.msk.f32.vlgmr.msra.gmra.mrb[0].mxu0 %vm376_vm13, %v355_v19  ;;  %955 = vmatmul.mubr.msk.f32.vlgmr.msra.gmra.mrb[0].mxu1 %vm376_vm13, %v355_v19 }
  0xe4   :  { %828 = vmatprep.mubr.f32.mxu0 %v1112_v0  ;;  %899 = vmatprep.mubr.f32.mxu1 %v1112_v0 }
 0x1b6   :  { %v459_v32 = vpop.f32.mrb[0].mxu0  ;;  %v530_v36 = vpop.f32.mrb[0].mxu1 }
 0x1b7   :  { %v1495_v40 = vmax.f32 %v459_v32, 0.0  ;;  %v461_v50 = vpop.f32.mrb[1].mxu0  ;;  %v1497_v51 = vmax.f32 %v530_v36, 0.0  ;;  %v532_v52 = vpop.f32.mrb[1].mxu1 }
 0x1b8   :  { %v1499_v53 = vmax.f32 %v461_v50, 0.0  ;;  %v1501_v14 = vmax.f32 %v532_v52, 0.0 }
 0x1b9   :  { %539 = vrot.lane.b32.xlu0 %v1495_v40, %s1115_s9 }
 0x1ba   :  { %541 = vrot.lane.b32.xlu1 %v1499_v53, %s1115_s9 }
 0x1bd   :  { %543 = vrot.lane.b32.xlu0 %v1497_v51, %s1115_s9 }
 0x1be   :  { %545 = vrot.lane.b32.xlu1 %v1501_v14, %s1115_s9 }
 0x1c1   :  { %559 = vrot.lane.b32.xlu0 %v1495_v40, %s1113_s8 }
 0x1c2   :  { %561 = vrot.lane.b32.xlu1 %v1499_v53, %s1113_s8 }
 0x1c5   :  { %563 = vrot.lane.b32.xlu0 %v1497_v51, %s1113_s8 }
 0x1c6   :  { %565 = vrot.lane.b32.xlu1 %v1501_v14, %s1113_s8 }
 0x1c9   :  { %579 = vrot.lane.b32.xlu0 %v1495_v40, %s1116_s10 }
 0x1ca   :  { %581 = vrot.lane.b32.xlu1 %v1499_v53, %s1116_s10 }
 0x1cd   :  { %583 = vrot.lane.b32.xlu0 %v1497_v51, %s1116_s10 }
 0x1ce   :  { %585 = vrot.lane.b32.xlu1 %v1501_v14, %s1116_s10 }
 0x1d1   :  { %599 = vrot.lane.b32.xlu0 %v1495_v40, %s1114_s1 }
 0x1d2   :  { %601 = vrot.lane.b32.xlu1 %v1499_v53, %s1114_s1 }
 0x1d5   :  { %603 = vrot.lane.b32.xlu0 %v1497_v51, %s1114_s1 }
 0x1d6   :  { %605 = vrot.lane.b32.xlu1 %v1501_v14, %s1114_s1 }
 0x1d9   :  { %623 = vrot.lane.b32.xlu0 %v1495_v40, %s1117_s11 }
 0x1da   :  { %625 = vrot.lane.b32.xlu1 %v1499_v53, %s1117_s11 }
 0x1dd   :  { %627 = vrot.lane.b32.xlu0 %v1497_v51, %s1117_s11 }
 0x1de   :  { %629 = vrot.lane.b32.xlu1 %v1501_v14, %s1117_s11 }
 0x1e1   :  { %643 = vrot.lane.b32.xlu0 %v1495_v40, %s1120_s13 }
 0x1e2   :  { %645 = vrot.lane.b32.xlu1 %v1499_v53, %s1120_s13 }
 0x1e5   :  { %647 = vrot.lane.b32.xlu0 %v1497_v51, %s1120_s13 }
 0x1e6   :  { %649 = vrot.lane.b32.xlu1 %v1501_v14, %s1120_s13 }
 0x1e9   :  { %663 = vrot.lane.b32.xlu0 %v1495_v40, %s1118_s12 }
 0x1ea   :  { %665 = vrot.lane.b32.xlu1 %v1499_v53, %s1118_s12 }
 0x1ed   :  { %667 = vrot.lane.b32.xlu0 %v1497_v51, %s1118_s12 }
 0x1ee   :  { %669 = vrot.lane.b32.xlu1 %v1501_v14, %s1118_s12 }
 0x1f1   :  { %683 = vrot.lane.b32.xlu0 %v1495_v40, %s1121_s14 }
 0x1f2   :  { %685 = vrot.lane.b32.xlu1 %v1499_v53, %s1121_s14 }
 0x1f5   :  { %687 = vrot.lane.b32.xlu0 %v1497_v51, %s1121_s14 }
 0x1f6   :  { %689 = vrot.lane.b32.xlu1 %v1501_v14, %s1121_s14 }
 0x22b   :  { %v540_v0 = vpop.permute.xlu0 %539 }
 0x22c   :  { %v542_v20 = vpop.permute.xlu1 %541 }
 0x22d   :  { %v549_v21 = vsel %vm136_vm11, %v540_v0, %v542_v20 }
 0x22e   :  { %v552_v55 = vmul.f32 %v549_v21, %v1312_v57 }
 0x22f   :  { %v544_v56 = vpop.permute.xlu0 %543 }
 0x230   :  { %v548_v58 = vsel %vm136_vm11, %v542_v20, %v544_v56  ;;  %v546_v59 = vpop.permute.xlu1 %545 }
 0x231   :  { %v553_v60 = vmul.f32 %v548_v58, %v1327_v9  ;;  %v547_v61 = vsel %vm136_vm11, %v544_v56, %v546_v59  ;;  %v550_v62 = vsel %vm136_vm11, %v546_v59, %v540_v0 }
 0x232   :  { %v551_v63 = vmul.f32 %v550_v62, %v1322_v6  ;;  %v554_v3 = vmul.f32 %v547_v61, %v1331_v10 }
 0x233   :  { %v560_v15 = vpop.permute.xlu0 %559 }
 0x234   :  { %v562_v16 = vpop.permute.xlu1 %561 }
 0x235   :  { %v569_v57 = vsel %vm157_vm3, %v560_v15, %v562_v16 }
 0x236   :  { %v572_v17 = vmul.f32 %v1277_v34, %v569_v57 }
 0x237   :  { %v564_v18 = vpop.permute.xlu0 %563 }
 0x238   :  { %v568_v9 = vsel %vm157_vm3, %v562_v16, %v564_v18  ;;  %v566_v19 = vpop.permute.xlu1 %565  ;;  %v978_v24 = vpack.c.bf16 %v572_v17, %v552_v55 }
 0x239   :  { %v573_v12 = vmul.f32 %v1280_v35, %v568_v9  ;;  %v567_v6 = vsel %vm157_vm3, %v564_v18, %v566_v19  ;;  %v570_v10 = vsel %vm157_vm3, %v566_v19, %v560_v15  ;;  %vm751_vm3 = vcmask 1040384  }
 0x23a   :  { %v571_v30 = vmul.f32 %v1256_v22, %v570_v10  ;;  %v574_v31 = vmul.f32 %v1259_v23, %v567_v6  ;;  %979 = vmatprep.subr.bf16.mxu0 %v978_v24 }
 0x23b   :  { %v580_v34 = vpop.permute.xlu0 %579  ;;  %v1002_v0 = vpack.c.bf16 %v573_v12, %v553_v60 }
 0x23c   :  { %v582_v32 = vpop.permute.xlu1 %581  ;;  %v980_v36 = vpack.c.bf16 %v571_v30, %v551_v63  ;;  %v1000_v50 = vpack.c.bf16 %v574_v31, %v554_v3 }
 0x23d   :  { %v589_v52 = vsel %vm190_vm0, %v580_v34, %v582_v32 }
 0x23e   :  { %v592_v35 = vmul.f32 %v589_v52, %v1348_v26  ;;  %981 = vmatpush1.bf16.msra.mxu0 %v980_v36  ;;  %1001 = vmatprep.subr.bf16.mxu1 %v1000_v50 }
 0x23f   :  { %v584_v20 = vpop.permute.xlu0 %583  ;;  %1003 = vmatpush1.bf16.msra.mxu1 %v1002_v0 }
 0x240   :  { %v588_v22 = vsel %vm190_vm0, %v582_v32, %v584_v20  ;;  %v586_v21 = vpop.permute.xlu1 %585 }
 0x241   :  { %v593_v23 = vmul.f32 %v588_v22, %v1372_v38  ;;  %v587_v55 = vsel %vm190_vm0, %v584_v20, %v586_v21  ;;  %v590_v56 = vsel %vm190_vm0, %v586_v21, %v580_v34 }
 0x242   :  { %v591_v58 = vmul.f32 %v590_v56, %v1368_v37  ;;  %v594_v26 = vmul.f32 %v587_v55, %v1376_v39 }
 0x243   :  { %v600_v59 = vpop.permute.xlu0 %599 }
 0x244   :  { %v602_v60 = vpop.permute.xlu1 %601 }
 0x245   :  { %v609_v61 = vsel %vm211_vm7, %v600_v59, %v602_v60 }
 0x246   :  { %v612_v62 = vmul.f32 %v1274_v33, %v609_v61 }
 0x247   :  { %v604_v63 = vpop.permute.xlu0 %603 }
 0x248   :  { %v608_v38 = vsel %vm211_vm7, %v602_v60, %v604_v63  ;;  %v606_v3 = vpop.permute.xlu1 %605  ;;  %v982_v15 = vpack.c.bf16 %v612_v62, %v592_v35 }
 0x249   :  { %v613_v16 = vmul.f32 %v1299_v47, %v608_v38  ;;  %v607_v37 = vsel %vm211_vm7, %v604_v63, %v606_v3  ;;  %v610_v39 = vsel %vm211_vm7, %v606_v3, %v600_v59  ;;  %vm1122_vm7 = vmmov 1  }
 0x24a   :  { %v611_v57 = vmul.f32 %v1296_v46, %v610_v39  ;;  %v614_v17 = vmul.f32 %v1302_v48, %v607_v37  ;;  %983 = vmatprep.subr.bf16.mxu0 %v982_v15  ;;  %v744_v39 = vld [vmem:[#allocation3 + $0x128] sm:$0x1]  ;;  %vm995_vm11 = vmpackc.low %vm751_vm3, %vm1122_vm7 }
 0x24b   :  { %v624_v33 = vpop.permute.xlu0 %623  ;;  %v1006_v12 = vpack.c.bf16 %v613_v16, %v593_v23 }
 0x24c   :  { %v626_v18 = vpop.permute.xlu1 %625  ;;  %v984_v9 = vpack.c.bf16 %v611_v57, %v591_v58  ;;  %v1004_v19 = vpack.c.bf16 %v614_v17, %v594_v26 }
 0x24d   :  { %v633_v24 = vsel %vm248_vm1, %v624_v33, %v626_v18 }
 0x24e   :  { %v635_v47 = vmul.f32 %v1355_v25, %v633_v24  ;;  %985 = vmatpush1.bf16.msra.mxu0 %v984_v9  ;;  %1005 = vmatprep.subr.bf16.mxu1 %v1004_v19  ;;  %v745_v9 = vld [vmem:[#allocation3 + $0x130] sm:$0x1] }
 0x24f   :  { %v628_v6 = vpop.permute.xlu0 %627  ;;  %1007 = vmatpush1.bf16.msra.mxu1 %v1006_v12 }
 0x250   :  { %v632_v46 = vsel %vm248_vm1, %v626_v18, %v628_v6  ;;  %v630_v10 = vpop.permute.xlu1 %629  ;;  %v988_v52 = vpack.c.bf16 %v635_v47, %v1495_v40  ;;  %v743_v18 = vld [vmem:[#allocation3 + $0x120] sm:$0x1] }
 0x251   :  { %v636_v48 = vmul.f32 %v1334_v11, %v632_v46  ;;  %v631_v30 = vsel %vm248_vm1, %v628_v6, %v630_v10  ;;  %v634_v31 = vsel %vm248_vm1, %v630_v10, %v624_v33 }
 0x252   :  { %v637_v34 = vmul.f32 %v1358_v28, %v631_v30  ;;  %v638_v25 = vmul.f32 %v1361_v29, %v634_v31 }
 0x253   :  { %v644_v32 = vpop.permute.xlu0 %643  ;;  %v986_v36 = vpack.c.bf16 %v636_v48, %v1499_v53 }
 0x254   :  { %v646_v50 = vpop.permute.xlu1 %645  ;;  %v1008_v0 = vpack.c.bf16 %v638_v25, %v1501_v14  ;;  %v1010_v11 = vpack.c.bf16 %v637_v34, %v1497_v51 }
 0x255   :  { %v653_v35 = vsel %vm281_vm9, %v644_v32, %v646_v50  ;;  %987 = vmatprep.subr.bf16.mxu0 %v986_v36 }
 0x256   :  { %v655_v20 = vmul.f32 %v653_v35, %v1434_v54  ;;  %989 = vmatpush1.bf16.msra.mxu0 %v988_v52  ;;  %1009 = vmatprep.subr.bf16.mxu1 %v1008_v0 }
 0x257   :  { %v648_v28 = vpop.permute.xlu0 %647  ;;  %1011 = vmatpush1.bf16.msra.mxu1 %v1010_v11 }
 0x258   :  { %v652_v29 = vsel %vm281_vm9, %v646_v50, %v648_v28  ;;  %v650_v53 = vpop.permute.xlu1 %649 }
 0x259   :  { %v656_v40 = vmul.f32 %v652_v29, %v1449_v13  ;;  %v651_v14 = vsel %vm281_vm9, %v648_v28, %v650_v53  ;;  %v654_v51 = vsel %vm281_vm9, %v650_v53, %v644_v32 }
 0x25a   :  { %v657_v22 = vmul.f32 %v651_v14, %v1453_v5  ;;  %v658_v54 = vmul.f32 %v654_v51, %v1445_v4 }
 0x25b   :  { %v664_v21 = vpop.permute.xlu0 %663 }
 0x25c   :  { %v666_v23 = vpop.permute.xlu1 %665 }
 0x25d   :  { %v673_v55 = vsel %vm302_vm4, %v664_v21, %v666_v23 }
 0x25e   :  { %v675_v56 = vmul.f32 %v1403_v8, %v673_v55 }
 0x25f   :  { %v668_v58 = vpop.permute.xlu0 %667 }
 0x260   :  { %v672_v13 = vsel %vm302_vm4, %v666_v23, %v668_v58  ;;  %v670_v26 = vpop.permute.xlu1 %669  ;;  %v992_v38 = vpack.c.bf16 %v675_v56, %v655_v20 }
 0x261   :  { %v676_v59 = vmul.f32 %v1419_v45, %v672_v13  ;;  %v671_v60 = vsel %vm302_vm4, %v668_v58, %v670_v26  ;;  %v674_v4 = vsel %vm302_vm4, %v670_v26, %v664_v21 }
 0x262   :  { %v677_v5 = vmul.f32 %v1424_v49, %v671_v60  ;;  %v678_v61 = vmul.f32 %v1414_v44, %v674_v4 }
 0x263   :  { %v684_v62 = vpop.permute.xlu0 %683  ;;  %v990_v63 = vpack.c.bf16 %v676_v59, %v656_v40 }
 0x264   :  { %v686_v8 = vpop.permute.xlu1 %685  ;;  %v1012_v3 = vpack.c.bf16 %v678_v61, %v658_v54  ;;  %v1014_v15 = vpack.c.bf16 %v677_v5, %v657_v22 }
 0x265   :  { %v693_v16 = vsel %vm335_vm10, %v684_v62, %v686_v8  ;;  %991 = vmatprep.subr.bf16.mxu0 %v990_v63 }
 0x266   :  { %v695_v45 = vmul.f32 %v693_v16, %v1463_v27  ;;  %993 = vmatpush1.bf16.msra.mxu0 %v992_v38  ;;  %1013 = vmatprep.subr.bf16.mxu1 %v1012_v3  ;;  %v746_v27 = vld [vmem:[#allocation3 + $0x138] sm:$0x1] }
 0x267   :  { %v688_v37 = vpop.permute.xlu0 %687  ;;  %1015 = vmatpush1.bf16.msra.mxu1 %v1014_v15 }
 0x268   :  { %v692_v44 = vsel %vm335_vm10, %v686_v8, %v688_v37  ;;  %v690_v49 = vpop.permute.xlu1 %689  ;;  %v997_v47 = vpack.c.bf16 %v743_v18, %v695_v45 }
 0x269   :  { %v696_v57 = vmul.f32 %v692_v44, %v1478_v42  ;;  %v691_v17 = vsel %vm335_vm10, %v688_v37, %v690_v49  ;;  %v694_v33 = vsel %vm335_vm10, %v690_v49, %v684_v62 }
 0x26a   :  { %v697_v19 = vmul.f32 %v691_v17, %v1482_v43  ;;  %v698_v24 = vmul.f32 %v694_v33, %v1474_v41 }
 0x26b   :  { %v994_v12 = vpack.c.bf16 %v744_v39, %v696_v57 }
 0x26c   :  { %v1016_v6 = vpack.c.bf16 %v746_v27, %v698_v24  ;;  %v1019_v46 = vpack.c.bf16 %v745_v9, %v697_v19 }
 0x26d   :  { %996 = vmatprep.subr.msk.bf16.mxu0 %vm995_vm11, %v994_v12 }
 0x26e   :  { %999 = vmatpush1.bf16.msk.msra.mxu0 %vm995_vm11, %v997_v47  ;;  %1018 = vmatprep.subr.msk.bf16.mxu1 %vm995_vm11, %v1016_v6 }
 0x26f   :  { %1021 = vmatpush1.bf16.msk.msra.mxu1 %vm995_vm11, %v1019_v46 }
 0x271   :  { %958 = vmatmul.mubr.msk.f32.vlgmr.msra.gmra.mrb[2].mxu0 %vm747_vm14, %v706_v7 }
 0x272   :  { %961 = vmatmul.mubr.msk.f32.vlgmr.msra.gmra.mrb[2].mxu1 %vm747_vm14, %v706_v7 }
 0x344   :  { %v830_v42 = vpop.f32.mrb[2].mxu0 }
 0x345   :  { %v832_v43 = vpop.f32.mrb[3].mxu0  ;;  %v901_v41 = vpop.f32.mrb[2].mxu1 }
 0x346   :  { %v910_v10 = vcombine.low %v830_v42, %v832_v43  ;;  %v903_v48 = vpop.f32.mrb[3].mxu1 }
 0x347   :  { %v911_v30 = vcombine.low %v901_v41, %v903_v48 }
 0x348   :  { %v914_v31 = vadd.f32 %v910_v10, %v1172_v2 }
 0x349   :  { %v915_v34 = vadd.f32 %v911_v30, %v1170_v1 }
 0x34a   :  { %916 = vst [vmem:[#allocation9] sm:$0xff] %v914_v31 }
 0x34b   :  { %917 = vst [vmem:[#allocation9 + $0x8] sm:$0xff] %v915_v34 }
 0x34c   :  { %1093 = shalt.err (!%p1090_p6)
}
 0x34d   :  { %s1094_s21 = scalar_lea.hbm %s1687_s3, 256 }
 0x34e   :  { %p1095_p7 = scmp.ne.s32.totalorder %s1687_s3, %s1094_s21  ;;  %p1098_p8 = scmp.lt.u32.totalorder %s1094_s21, %s1687_s3 }
 0x350   :  { %p1100_p9 = pnand %p1098_p8, %p1095_p7 }
 0x352   :  { %1103 = shalt.err (!%p1100_p9)
}
 0x353   :  { %927 = dma.vmem_to_hbm [thread:$0]  %s925_s18, 256, %s1687_s3, [#allocation6]  }
 0x354   :  { %1108 = dma.done.wait [#allocation6], 256  }
 0x355   :  { %1109 = vsyncadd [#allocation6], 4294967040 }
 0x356   :  { %931 = vsyncpa [#allocation5], 1 }
 0x357   :  { %932 = vsyncpa [#allocation8], 1 }
 0x358   :  { %933 = vsyncpa [#allocation6], 1 }

</bundles_post_ra>
